<compile_context>
chip_gen: v7x
topology: tpu7x:2x2x1
jax: 0.10.0
libtpu: 0.0.40
codegen_flags: <defaults>
</compile_context>

<pallas_src>
import functools

import jax
import jax.numpy as jnp
from jax.experimental import pallas as pl
from jax.experimental.pallas import tpu as pltpu

_LANE = 128           # lane width: A's minor dim / feature dims padded to this
_DST_ALIGN = 16       # bf16 sublane packing for A's second-minor (dst) dim
_MAX_TILE_DST = 512
_MAX_TILE_SRC = 1024
_DST_MIN_SPLIT = 256  # keep >= 2 dst tiles (v7x 2-TC megacore) once enough work


def _round_up(n, m):
    return ((n + m - 1) // m) * m


def _choose_tile(n, cap, align, min_split=None):
    """Pick a tile size (multiple of `align`) and the padded extent it divides."""
    n_al = _round_up(max(n, 1), align)
    num = -(-n_al // cap)                       # minimum number of tiles
    if min_split is not None and num == 1 and n_al >= min_split:
        num = 2                                 # shard dst over v7x's 2 TensorCores
    tile = _round_up(-(-n_al // num), align)
    return tile, _round_up(n_al, tile)


def _pad2d(x, rows, cols):
    return jnp.pad(x, ((0, rows - x.shape[0]), (0, cols - x.shape[1])))


def _rgcn_agg_kernel(a_ref, xwn_ref, b_ref, o_ref, acc_ref, *, apply_relu):
    """One HeteroGraphConv layer (sum agg) for one destination node type.

    Grid: (dst_tiles [parallel], relations [arbitrary], src_tiles [arbitrary]).

    a_ref  : (1, TILE_DST, TILE_SRC) bf16   A_r block, rows pre-scaled by D_dst^-1/2
    xwn_ref: (1, TILE_SRC, F_out)    bf16   precomputed (X_src(r) @ W_r) * D_src^-1/2
    b_ref  : (1, F_out)              f32    sum of per-relation biases
    o_ref  : (TILE_DST, F_out)              aggregated output block
    acc_ref: VMEM (TILE_DST, F_out)  f32    accumulator
    """
    r = pl.program_id(1)
    k = pl.program_id(2)

    @pl.when((r == 0) & (k == 0))
    def _():
        acc_ref[...] = jnp.zeros_like(acc_ref)

    # Single bf16 MXU matmul per grid step, f32 accumulation.
    acc_ref[...] += jnp.dot(a_ref[0], xwn_ref[0],
                            preferred_element_type=jnp.float32)

    @pl.when((r == pl.num_programs(1) - 1) & (k == pl.num_programs(2) - 1))
    def _():
        res = acc_ref[...] + b_ref[...]
        if apply_relu:
            res = jnp.maximum(res, 0.0)
        o_ref[...] = res.astype(o_ref.dtype)


def _hetero_conv_dst(a_stack, xwn_stack, b_sum, tile_dst, tile_src,
                     out_dtype, apply_relu):
    """Run one layer for a single destination node type (sum over relations).

    a_stack  : (R, N_dst_pad, N_src_pad) bf16 (nd folded into rows)
    xwn_stack: (R, N_src_pad, F_out)     bf16
    b_sum    : (1, F_out)                f32
    """
    R, n_dst_pad, n_src_pad = a_stack.shape
    f_out = xwn_stack.shape[-1]
    out_itemsize = jnp.dtype(out_dtype).itemsize

    # Double-buffered working set -> explicit VMEM limit (cap: v7x 64 MiB phys).
    need = (2 * tile_dst * tile_src * 2        # A tiles (bf16)
            + 2 * tile_src * f_out * 2         # xwn tiles (bf16)
            + 2 * tile_dst * f_out * out_itemsize
            + 2 * f_out * 4                    # bias
            + tile_dst * f_out * 4)            # accumulator scratch
    vmem_limit = int(min(max(2 * need, 16 * 1024 * 1024), 48 * 1024 * 1024))

    kern = functools.partial(_rgcn_agg_kernel, apply_relu=apply_relu)
    return pl.pallas_call(
        kern,
        out_shape=jax.ShapeDtypeStruct((n_dst_pad, f_out), out_dtype),
        grid_spec=pltpu.PrefetchScalarGridSpec(
            num_scalar_prefetch=0,
            grid=(n_dst_pad // tile_dst, R, n_src_pad // tile_src),
            in_specs=[
                pl.BlockSpec((1, tile_dst, tile_src), lambda d, r, k: (r, d, k)),
                pl.BlockSpec((1, tile_src, f_out), lambda d, r, k: (r, k, 0)),
                pl.BlockSpec((1, f_out), lambda d, r, k: (0, 0)),
            ],
            out_specs=pl.BlockSpec((tile_dst, f_out), lambda d, r, k: (d, 0)),
            scratch_shapes=[pltpu.VMEM((tile_dst, f_out), jnp.float32)],
        ),
        compiler_params=pltpu.CompilerParams(
            dimension_semantics=("parallel", "arbitrary", "arbitrary"),
            vmem_limit_bytes=vmem_limit),
    )(a_stack, xwn_stack, b_sum)


def _prepare_graph(adj, inputs, canonical_etypes):
    """Per-dst-type relation stacks + degree norms, computed ONCE for both layers.

    The destination norm D_dst^-1/2 is folded into the adjacency rows here
    (shared by both layers); the source norm D_src^-1/2 is kept per relation
    and folded into the per-layer XW precompute.
    """
    n_nodes = {t: v.shape[0] for t, v in inputs.items()}
    prep = {}
    for t in sorted({d for (_, _, d) in canonical_etypes}):
        rels = [(s, r, d) for (s, r, d) in canonical_etypes if d == t]
        n_dst = n_nodes[t]
        max_src = max(n_nodes[s] for (s, _, _) in rels)
        tile_dst, n_dst_pad = _choose_tile(n_dst, _MAX_TILE_DST, _DST_ALIGN,
                                           min_split=_DST_MIN_SPLIT)
        tile_src, n_src_pad = _choose_tile(max_src, _MAX_TILE_SRC, _LANE)

        a_list, ns_list = [], []
        for (s, r, _) in rels:
            a = adj[(s, r, t)].astype(jnp.float32)                  # (n_dst, n_src)
            ns = jax.lax.rsqrt(jnp.maximum(jnp.sum(a, axis=0), 1.0))  # src degree
            nd = jax.lax.rsqrt(jnp.maximum(jnp.sum(a, axis=1), 1.0))  # dst degree
            a_nd = a * nd[:, None]                                  # fold nd into rows
            a_list.append(_pad2d(a_nd, n_dst_pad, n_src_pad).astype(jnp.bfloat16))
            ns_list.append(ns[:, None])                             # (n_src, 1)

        prep[t] = {
            "a": jnp.stack(a_list),       # (R, n_dst_pad, n_src_pad) bf16
            "ns": ns_list,                # per-relation (n_src, 1) f32
            "rels": rels,
            "n_dst": n_dst,
            "n_src_pad": n_src_pad,
            "tile_dst": tile_dst,
            "tile_src": tile_src,
        }
    return prep


def _hetero_layer(prep, inputs, layer_params, apply_relu, out_dtype):
    """One HeteroGraphConv layer over all destination node types (sum agg)."""
    f_out = next(iter(layer_params.values()))["w"].shape[1]
    f_out_pad = _round_up(f_out, _LANE)
    out = {}
    for t, info in prep.items():
        xwn_list = []
        b_sum = jnp.zeros((f_out,), jnp.float32)
        for i, (s, r, _) in enumerate(info["rels"]):
            w = layer_params[r]["w"]
            b_sum = b_sum + layer_params[r]["b"]
            # Hoisted per-relation XW * ns precompute (tiny XLA matmul),
            # streamed into the kernel as a single bf16 operand.
            xw = jnp.dot(inputs[s].astype(jnp.float32), w,
                         preferred_element_type=jnp.float32)
            xwn = xw * info["ns"][i]
            xwn_list.append(
                _pad2d(xwn, info["n_src_pad"], f_out_pad).astype(jnp.bfloat16))
        xwn_stack = jnp.stack(xwn_list)                    # (R, n_src_pad, f_out_pad)
        b_pad = jnp.zeros((1, f_out_pad), jnp.float32).at[0, :f_out].set(b_sum)

        y = _hetero_conv_dst(info["a"], xwn_stack, b_pad,
                             info["tile_dst"], info["tile_src"],
                             out_dtype, apply_relu)
        out[t] = y[:info["n_dst"], :f_out]
    return out


def my_rgcn_forward(adj, inputs, params, canonical_etypes):
    prep = _prepare_graph(adj, inputs, canonical_etypes)   # norms/A shared by both layers
    # Layer-1 hidden activations in bf16 (halves intermediate HBM traffic).
    h = _hetero_layer(prep, inputs, params["conv1"], apply_relu=True,
                      out_dtype=jnp.bfloat16)
    h = _hetero_layer(prep, h, params["conv2"], apply_relu=False,
                      out_dtype=jnp.float32)
    return h


def _reference_forward(adj, inputs, params, canonical_etypes):
    """Pure-JAX f32 reference for correctness checking."""
    def layer(x_in, lp, relu):
        out = {}
        for (s, r, d) in canonical_etypes:
            a = adj[(s, r, d)]
            ns = jax.lax.rsqrt(jnp.maximum(jnp.sum(a, axis=0, keepdims=True), 1.0))
            nd = jax.lax.rsqrt(jnp.maximum(jnp.sum(a, axis=1, keepdims=True), 1.0))
            a_norm = a * nd * ns
            y = a_norm @ (x_in[s] @ lp[r]["w"]) + lp[r]["b"][None, :]
            out[d] = out.get(d, 0.0) + y
        if relu:
            out = {k: jnp.maximum(v, 0.0) for k, v in out.items()}
        return out

    h = layer(inputs, params["conv1"], True)
    return layer(h, params["conv2"], False)


if __name__ == "__main__":
    # Small hetero graph: 2 node types, 3 relations, 8 nodes per type.
    N = 8
    in_feats, hid_feats, out_feats = 16, 32, 8
    canonical_etypes = [
        ("user", "follows", "user"),
        ("user", "buys", "item"),
        ("item", "bought_by", "user"),
    ]
    rel_names = [r for (_, r, _) in canonical_etypes]

    key = jax.random.PRNGKey(0)
    k_adj, k_feat, k_w1, k_w2 = jax.random.split(key, 4)

    # Deterministic dense adjacencies [N_dst, N_src] (binary).
    adj = {}
    for i, (s, r, d) in enumerate(canonical_etypes):
        ka = jax.random.fold_in(k_adj, i)
        adj[(s, r, d)] = (jax.random.uniform(ka, (N, N)) < 0.4).astype(jnp.float32)

    # Node features per type.
    inputs = {
        "user": jax.random.normal(jax.random.fold_in(k_feat, 0), (N, in_feats), jnp.float32),
        "item": jax.random.normal(jax.random.fold_in(k_feat, 1), (N, in_feats), jnp.float32),
    }

    # Deterministic parameter init (xavier-ish weights, small random biases to
    # exercise the bias path).
    def init_layer(key_w, f_in, f_out):
        p = {}
        for i, r in enumerate(rel_names):
            kw = jax.random.fold_in(key_w, i)
            kb = jax.random.fold_in(kw, 12345)
            scale = (2.0 / (f_in + f_out)) ** 0.5
            p[r] = {
                "w": scale * jax.random.normal(kw, (f_in, f_out), jnp.float32),
                "b": 0.1 * jax.random.normal(kb, (f_out,), jnp.float32),
            }
        return p

    params = {
        "conv1": init_layer(k_w1, in_feats, hid_feats),
        "conv2": init_layer(k_w2, hid_feats, out_feats),
    }

    out = my_rgcn_forward(adj, inputs, params, canonical_etypes)
    out = jax.tree_util.tree_map(jax.block_until_ready, out)

    ref = _reference_forward(adj, inputs, params, canonical_etypes)
    for t in out:
        assert out[t].shape == (N, out_feats), (t, out[t].shape)
        # Tolerance accounts for bf16 operands (nd-folded A, XW*ns, bf16 hidden
        # activations); accumulation is f32 throughout.
        assert jnp.allclose(out[t], ref[t], atol=5e-2, rtol=5e-2), \
            f"mismatch for node type {t}: max err {jnp.max(jnp.abs(out[t] - ref[t]))}"

    print("KERNEL_OK")
</pallas_src>

<mosaic_0001>
module attributes {stable_mosaic.version = 11 : i64} {
  func.func @_rgcn_agg_kernel(%arg0: i32, %arg1: i32, %arg2: i32, %arg3: memref<1x16x128xbf16, #tpu.memory_space<vmem>>, %arg4: memref<1x128x128xbf16, #tpu.memory_space<vmem>>, %arg5: memref<1x128xf32, #tpu.memory_space<vmem>>, %arg6: memref<16x128xbf16, #tpu.memory_space<vmem>>, %arg7: memref<16x128xf32, #tpu.memory_space<vmem>>) attributes {dimension_semantics = [#tpu.dimension_semantics<parallel>, #tpu.dimension_semantics<arbitrary>, #tpu.dimension_semantics<arbitrary>], iteration_bounds = array<i64: 1, 1, 1>, scalar_prefetch = 0 : i64, scratch_operands = 1 : i64, tpu.core_type = #tpu.core_type<tc>, window_params = [{transform_indices = @transform_0, window_bounds = array<i64: 1, 16, 128>}, {transform_indices = @transform_1, window_bounds = array<i64: 1, 128, 128>}, {pipeline_mode = #tpu.pipeline_mode<synchronous>, transform_indices = @transform_2, window_bounds = array<i64: 1, 128>}, {transform_indices = @transform_3, window_bounds = array<i64: 16, 128>}]} {
    %c0_i32 = arith.constant 0 : i32
    %0 = arith.cmpi eq, %arg1, %c0_i32 : i32
    %c0_i32_0 = arith.constant 0 : i32
    %1 = arith.cmpi eq, %arg2, %c0_i32_0 : i32
    %2 = arith.andi %0, %1 : i1
    %3 = arith.extui %2 : i1 to i32
    %c0_i32_1 = arith.constant 0 : i32
    %4 = arith.cmpi ne, %3, %c0_i32_1 : i32
    scf.if %4 {
      %cst_14 = arith.constant 0.000000e+00 : f32
      %18 = vector.broadcast %cst_14 : f32 to vector<16x128xf32>
      %c0_15 = arith.constant 0 : index
      %c0_16 = arith.constant 0 : index
      %19 = vector.load %arg7[%c0_15, %c0_16] : memref<16x128xf32, #tpu.memory_space<vmem>>, vector<16x128xf32>
      tpu.vector_store %arg7[%c0_15, %c0_16], %18 {strides = array<i32>} : memref<16x128xf32, #tpu.memory_space<vmem>>, vector<16x128xf32>,
    } else {
    }
    %c0 = arith.constant 0 : index
    %c0_2 = arith.constant 0 : index
    %5 = vector.load %arg7[%c0, %c0_2] : memref<16x128xf32, #tpu.memory_space<vmem>>, vector<16x128xf32>
    %c0_3 = arith.constant 0 : index
    %c0_4 = arith.constant 0 : index
    %c0_5 = arith.constant 0 : index
    %6 = vector.load %arg3[%c0_3, %c0_4, %c0_5] : memref<1x16x128xbf16, #tpu.memory_space<vmem>>, vector<1x16x128xbf16>
    %7 = vector.shape_cast %6 : vector<1x16x128xbf16> to vector<16x128xbf16>
    %c0_6 = arith.constant 0 : index
    %c0_7 = arith.constant 0 : index
    %c0_8 = arith.constant 0 : index
    %8 = vector.load %arg4[%c0_6, %c0_7, %c0_8] : memref<1x128x128xbf16, #tpu.memory_space<vmem>>, vector<1x128x128xbf16>
    %9 = vector.shape_cast %8 : vector<1x128x128xbf16> to vector<128x128xbf16>
    %cst = arith.constant dense<0.000000e+00> : vector<16x128xf32>
    %10 = tpu.matmul %7, %9, %cst {dimension_numbers = #tpu.dot_dimension_numbers<[1], [0], [0], [1], [0, 0, 1, 1], [], []>} : vector<16x128xbf16>, vector<128x128xbf16>, vector<16x128xf32> -> vector<16x128xf32>
    %11 = arith.addf %5, %10 : vector<16x128xf32>
    %c0_9 = arith.constant 0 : index
    %c0_10 = arith.constant 0 : index
    %12 = vector.load %arg7[%c0_9, %c0_10] : memref<16x128xf32, #tpu.memory_space<vmem>>, vector<16x128xf32>
    tpu.vector_store %arg7[%c0_9, %c0_10], %11 {strides = array<i32>} : memref<16x128xf32, #tpu.memory_space<vmem>>, vector<16x128xf32>,
    %c0_i32_11 = arith.constant 0 : i32
    %13 = arith.cmpi eq, %arg1, %c0_i32_11 : i32
    %c0_i32_12 = arith.constant 0 : i32
    %14 = arith.cmpi eq, %arg2, %c0_i32_12 : i32
    %15 = arith.andi %13, %14 : i1
    %16 = arith.extui %15 : i1 to i32
    %c0_i32_13 = arith.constant 0 : i32
    %17 = arith.cmpi ne, %16, %c0_i32_13 : i32
    scf.if %17 {
      %c0_14 = arith.constant 0 : index
      %c0_15 = arith.constant 0 : index
      %18 = vector.load %arg7[%c0_14, %c0_15] : memref<16x128xf32, #tpu.memory_space<vmem>>, vector<16x128xf32>
      %c0_16 = arith.constant 0 : index
      %c0_17 = arith.constant 0 : index
      %19 = vector.load %arg5[%c0_16, %c0_17] : memref<1x128xf32, #tpu.memory_space<vmem>>, vector<1x128xf32>
      %20 = vector.broadcast %19 : vector<1x128xf32> to vector<16x128xf32>
      %21 = arith.addf %18, %20 : vector<16x128xf32>
      %cst_18 = arith.constant 0.000000e+00 : f32
      %22 = vector.broadcast %cst_18 : f32 to vector<16x128xf32>
      %23 = arith.maximumf %21, %22 : vector<16x128xf32>
      %24 = arith.truncf %23 : vector<16x128xf32> to vector<16x128xbf16>
      %c0_19 = arith.constant 0 : index
      %c0_20 = arith.constant 0 : index
      %25 = vector.load %arg6[%c0_19, %c0_20] : memref<16x128xbf16, #tpu.memory_space<vmem>>, vector<16x128xbf16>
      tpu.vector_store %arg6[%c0_19, %c0_20], %24 {strides = array<i32>} : memref<16x128xbf16, #tpu.memory_space<vmem>>, vector<16x128xbf16>,
    } else {
    }
    return
  }
  func.func @transform_0(%arg0: i32, %arg1: i32, %arg2: i32) -> (i32, i32, i32) {
    %c0_i32 = arith.constant 0 : i32
    return %arg1, %arg0, %arg2 : i32, i32, i32
  }
  func.func @transform_1(%arg0: i32, %arg1: i32, %arg2: i32) -> (i32, i32, i32) {
    %c0_i32 = arith.constant 0 : i32
    %c0_i32_0 = arith.constant 0 : i32
    return %arg1, %arg2, %c0_i32 : i32, i32, i32
  }
  func.func @transform_2(%arg0: i32, %arg1: i32, %arg2: i32) -> (i32, i32) {
    %c0_i32 = arith.constant 0 : i32
    %c0_i32_0 = arith.constant 0 : i32
    %c0_i32_1 = arith.constant 0 : i32
    return %c0_i32, %c0_i32_0 : i32, i32
  }
  func.func @transform_3(%arg0: i32, %arg1: i32, %arg2: i32) -> (i32, i32) {
    %c0_i32 = arith.constant 0 : i32
    %c0_i32_0 = arith.constant 0 : i32
    return %arg0, %c0_i32 : i32, i32
  }
}

</mosaic_0001>

<bundles_post_ra>
// kernel: tpu_custom_call.1
= control target key start
LH: loop header
LB: loop body
LE: loop exit
PB: predicated region body
PF: predicated region fallthrough
CT: control target
= control target key end

     0   :  { %8 = vsyncpa [#allocation4], 0  ;;  %s425_s0 = inlined_call_operand.hbm [shape: bf16[1,16,128], index: 0, kind: input, shape index: {}]   ;;  %s426_s1 = inlined_call_operand.hbm [shape: bf16[1,128,128], index: 1, kind: input, shape index: {}]   ;;  %s427_s2 = inlined_call_operand.vmem [shape: f32[1,128], index: 2, kind: input, shape index: {}]   ;;  %s428_s3 = inlined_call_operand.hbm [shape: bf16[16,128], index: 3, kind: output, shape index: {}]  }
   0x1   :  { %9 = vsyncpa [#allocation7], 0 }
   0x2   :  { %10 = vsyncpa [#allocation5], 0  ;;  %s350_s12 = smov [#allocation3]   ;;  %s278_s16 = scalar_lea.hbm %s425_s0, 128 }
   0x3   :  { %s16_s13 = sshll.u32 %s350_s12, 4  ;;  %p279_p0 = scmp.ne.s32.totalorder %s425_s0, %s278_s16  ;;  %s17_s13 = int_to_ptr.vmem [resolvable:$true] %s16_s13 }
   0x4   :  { %p282_p1 = scmp.lt.u32.totalorder %s278_s16, %s425_s0 }
   0x6   :  { %p284_p2 = pnand %p282_p1, %p279_p0 }
   0x8   :  { %287 = shalt.err (!%p284_p2)
}
   0x9   :  { %s288_s21 = scalar_lea.vmem %s17_s13, 128  ;;  %p293_p4 = scmp.lt.s32.totalorder %s17_s13, %s17_s13 }
   0xa   :  { %p289_p3 = scmp.ne.s32.totalorder %s17_s13, %s288_s21  ;;  %p294_p5 = scmp.lt.s32.totalorder %s288_s21, %s288_s21 }
   0xc   :  { %p295_p6 = por %p294_p5, %p293_p4 }
   0xe   :  { %p296_p7 = pnand %p295_p6, %p289_p3 }
  0x10   :  { %299 = shalt.err (!%p296_p7)
}
  0x11   :  { %s351_s22 = smov 64   ;;  %s352_s23 = smov 4  }
  0x12   :  { %22 = dma.hbm_to_vmem [thread:$0]  %s425_s0, 128, %s17_s13, [#allocation4], %s351_s22, %s351_s22, %s352_s23  }
  0x13   :  { %s353_s26 = smov [#allocation6]   ;;  %s300_s30 = scalar_lea.hbm %s426_s1, 1024 }
  0x14   :  { %s28_s27 = sshll.u32 %s353_s26, 4  ;;  %p301_p8 = scmp.ne.s32.totalorder %s426_s1, %s300_s30  ;;  %s29_s27 = int_to_ptr.vmem [resolvable:$true] %s28_s27 }
  0x15   :  { %p304_p9 = scmp.lt.u32.totalorder %s300_s30, %s426_s1 }
  0x17   :  { %p306_p10 = pnand %p304_p9, %p301_p8 }
  0x19   :  { %309 = shalt.err (!%p306_p10)
}
  0x1a   :  { %s310_s8 = scalar_lea.vmem %s29_s27, 1024  ;;  %p315_p12 = scmp.lt.s32.totalorder %s29_s27, %s29_s27 }
  0x1b   :  { %p311_p11 = scmp.ne.s32.totalorder %s29_s27, %s310_s8  ;;  %p316_p13 = scmp.lt.s32.totalorder %s310_s8, %s310_s8 }
  0x1d   :  { %p317_p0 = por %p316_p13, %p315_p12 }
  0x1f   :  { %p318_p1 = pnand %p317_p0, %p311_p11 }
  0x21   :  { %321 = shalt.err (!%p318_p1)
}
  0x22   :  { %34 = dma.hbm_to_vmem [thread:$0]  %s426_s1, 1024, %s29_s27, [#allocation7], %s351_s22, %s351_s22, %s352_s23  }
  0x23   :  { %344 = dma.done.wait [#allocation4], 128  }
  0x24   :  { %345 = vsyncadd [#allocation4], 4294967168 }
  0x25   :  { %346 = dma.done.wait [#allocation7], 1024  }
  0x26   :  { %347 = vsyncadd [#allocation7], 4294966272  ;;  %v354_v0 = vmov 0.0   ;;  %vm355_vm0 = vmmov 0   ;;  %v269_v1 = vld [vmem:[#allocation6] sm:$0xff]   ;;  %v270_v2 = vld [vmem:[#allocation6 + $0x8] sm:$0xff]  }
  0x27   :  { %242 = vmatprep.subr.bf16.mxu0 %v354_v0  ;;  %258 = vmatprep.mubr.msk.bf16.mxu0 %vm355_vm0, %v354_v0  ;;  %v271_v3 = vld [vmem:[#allocation6 + $0x10] sm:$0xff]   ;;  %v272_v4 = vld [vmem:[#allocation6 + $0x18] sm:$0xff]   ;;  %v273_v5 = vld [vmem:[#allocation6 + $0x20] sm:$0xff]   ;;  %s356_s11 = smov [#allocation8]  }
  0x28   :  { %243 = vmatpush3.bf16.msra.mxu0 %v269_v1  ;;  %v274_v6 = vld [vmem:[#allocation6 + $0x28] sm:$0xff]   ;;  %v275_v7 = vld [vmem:[#allocation6 + $0x30] sm:$0xff]   ;;  %v276_v8 = vld [vmem:[#allocation6 + $0x38] sm:$0xff]   ;;  %s201_s12 = sshll.u32 %s356_s11, 4  ;;  %s202_s12 = int_to_ptr.vmem [resolvable:$true] %s201_s12 }
  0x29   :  { %244 = vmatprep.subr.bf16.mxu0 %v354_v0  ;;  %v277_v9 = vld [vmem:[#allocation3] sm:$0xff]   ;;  %s322_s13 = scalar_lea.vmem %s202_s12, 128  ;;  %p327_p3 = scmp.lt.s32.totalorder %s202_s12, %s202_s12 }
  0x2a   :  { %v223_v10 = vld [vmem:[%s427_s2] ss:$0 sm:$0xff]  ;;  %p323_p2 = scmp.ne.s32.totalorder %s202_s12, %s322_s13  ;;  %p328_p4 = scmp.lt.s32.totalorder %s322_s13, %s322_s13 }
  0x2c   :  { %245 = vmatpush3.bf16.msra.mxu0 %v270_v2  ;;  %p329_p5 = por %p328_p4, %p327_p3 }
  0x2d   :  { %246 = vmatprep.subr.bf16.mxu0 %v354_v0 }
  0x2e   :  { %p330_p6 = pnand %p329_p5, %p323_p2 }
  0x30   :  { %247 = vmatpush3.bf16.msra.mxu0 %v271_v3 }
  0x31   :  { %248 = vmatprep.subr.bf16.mxu0 %v354_v0 }
  0x34   :  { %249 = vmatpush3.bf16.msra.mxu0 %v272_v4 }
  0x35   :  { %250 = vmatprep.subr.bf16.mxu0 %v354_v0 }
  0x38   :  { %251 = vmatpush3.bf16.msra.mxu0 %v273_v5 }
  0x39   :  { %252 = vmatprep.subr.bf16.mxu0 %v354_v0 }
  0x3c   :  { %253 = vmatpush3.bf16.msra.mxu0 %v274_v6 }
  0x3d   :  { %254 = vmatprep.subr.bf16.mxu0 %v354_v0 }
  0x40   :  { %255 = vmatpush3.bf16.msra.mxu0 %v275_v7 }
  0x41   :  { %256 = vmatprep.subr.bf16.mxu0 %v354_v0 }
  0x44   :  { %257 = vmatpush3.bf16.msra.mxu0 %v276_v8 }
  0x47   :  { %259 = vmatmul.mubr.bf16.vlgmr.msra.gmra.mrb[0].mxu0 %v277_v9 }
 0x11a   :  { %v160_v11 = vpop.f32.mrb[0].mxu0 }
 0x11b   :  { %v182_v12 = vadd.f32 %v223_v10, %v160_v11  ;;  %v260_v13 = vpop.f32.mrb[1].mxu0 }
 0x11c   :  { %v163_v14 = vpop.f32.mrb[2].mxu0 }
 0x11d   :  { %v183_v15 = vadd.f32 %v223_v10, %v163_v14  ;;  %v261_v16 = vpop.f32.mrb[3].mxu0  ;;  %v184_v17 = vmax.f32 %v182_v12, 0.0 }
 0x11f   :  { %v185_v18 = vmax.f32 %v183_v15, 0.0 }
 0x121   :  { %v231_v19 = vpack.c.bf16 %v185_v18, %v184_v17 }
 0x123   :  { %232 = vst [vmem:[#allocation8] sm:$0xff] %v231_v19  }
 0x124   :  { %333 = shalt.err (!%p330_p6)
}
 0x125   :  { %s334_s15 = scalar_lea.hbm %s428_s3, 128 }
 0x126   :  { %p335_p7 = scmp.ne.s32.totalorder %s428_s3, %s334_s15  ;;  %p338_p8 = scmp.lt.u32.totalorder %s334_s15, %s428_s3 }
 0x128   :  { %p340_p9 = pnand %p338_p8, %p335_p7 }
 0x12a   :  { %343 = shalt.err (!%p340_p9)
}
 0x12b   :  { %207 = dma.vmem_to_hbm [thread:$0]  %s202_s12, 128, %s428_s3, [#allocation5], %s351_s22, %s351_s22, %s352_s23  }
 0x12c   :  { %348 = dma.done.wait [#allocation5], 128  }
 0x12d   :  { %349 = vsyncadd [#allocation5], 4294967168 }
 0x12e   :  { %211 = vsyncpa [#allocation4], 1 }
 0x12f   :  { %212 = vsyncpa [#allocation7], 1 }
 0x130   :  { %213 = vsyncpa [#allocation5], 1 }

</bundles_post_ra>
